<compile_context>
chip_gen: v7x
topology: tpu7x:2x2x1
jax: 0.10.0
libtpu: 0.0.40
codegen_flags: <defaults>
</compile_context>

<pallas_src>
import math

import jax
import jax.numpy as jnp
from jax.experimental import pallas as pl
from jax.experimental.pallas import tpu as pltpu

INPUT_SIZE = 50
HIDDEN_SIZES = (256, 128, 128)
OUTPUT_SIZE = 9
PADDED_OUT = 128           # lane-dense output width (multiple of 128)
DEFAULT_BATCH_TILE = 4096  # sweepable: 2048 / 4096


def _mlp_kernel(x_ref,
                w1_ref, b1_ref,
                w2_ref, b2_ref,
                w3_ref, b3_ref,
                w4_ref, b4_ref,
                o_ref):
    # Cast the activation operand to bf16 just before each MXU matmul; keep
    # the accumulator and bias adds in f32.
    x = x_ref[...].astype(jnp.bfloat16)
    # Layer 1: Linear(50 -> 256) + ReLU
    h = jnp.dot(x, w1_ref[...], preferred_element_type=jnp.float32)
    h = jnp.maximum(h + b1_ref[...], 0.0)
    # Layer 2: Linear(256 -> 128) + Tanh
    h = jnp.dot(h.astype(jnp.bfloat16), w2_ref[...],
                preferred_element_type=jnp.float32)
    h = jnp.tanh(h + b2_ref[...])
    # Layer 3: Linear(128 -> 128) + ReLU
    h = jnp.dot(h.astype(jnp.bfloat16), w3_ref[...],
                preferred_element_type=jnp.float32)
    h = jnp.maximum(h + b3_ref[...], 0.0)
    # Layer 4: Linear(128 -> 9), zero-padded to 128 output lanes
    h = jnp.dot(h.astype(jnp.bfloat16), w4_ref[...],
                preferred_element_type=jnp.float32)
    o_ref[...] = (h + b4_ref[...]).astype(o_ref.dtype)


def _round_up(n, m):
    return ((n + m - 1) // m) * m


def _vmem_limit_bytes(batch_tile, weight_bytes):
    f32, bf16, lane = 4, 2, 128
    # double-buffered x tile (50 f32 lanes pad to 128 in VMEM) + bf16 out slab
    io_bytes = 2 * batch_tile * lane * f32 + 2 * batch_tile * PADDED_OUT * bf16
    # live intermediates inside the fused body (f32 accumulators + bf16 casts)
    act_bytes = batch_tile * (256 + 128 + 128 + PADDED_OUT) * (f32 + bf16)
    # weights/biases (conservatively assume they get double-buffered)
    w_bytes = 2 * weight_bytes
    limit = io_bytes + act_bytes + w_bytes + (8 << 20)   # headroom
    return int(min(max(limit, 16 << 20), 48 << 20))      # safe on v5e/v6e/v7x


def mlp_forward(x, params, *, batch_tile=None):
    """x: [B, INPUT_SIZE] float32; params: dict of transposed weights/biases."""
    B, F = x.shape
    assert F == INPUT_SIZE

    if batch_tile is None:
        # Big tiles amortize the ~0.35us per-grid-step overhead, but keep the
        # grid at >= ~4 steps so v7x's two TensorCores both get work.
        batch_tile = min(DEFAULT_BATCH_TILE, max(8, _round_up(-(-B // 4), 8)))
    assert batch_tile % 8 == 0, "batch_tile must be a multiple of 8 (f32 sublanes)"

    # Pad the batch up to a whole number of tiles; extra rows are sliced off.
    B_pad = _round_up(B, batch_tile)
    if B_pad != B:
        x = jnp.pad(x, ((0, B_pad - B), (0, 0)))
    grid = (B_pad // batch_tile,)

    # Weights in bf16 (MXU-native), biases in f32.
    w1 = params["w1"].astype(jnp.bfloat16)
    w2 = params["w2"].astype(jnp.bfloat16)
    w3 = params["w3"].astype(jnp.bfloat16)
    b1, b2, b3 = params["b1"], params["b2"], params["b3"]
    # Zero-pad the last layer to a lane-dense 128-wide output slab.
    w4 = jnp.pad(params["w4"],
                 ((0, 0), (0, PADDED_OUT - OUTPUT_SIZE))).astype(jnp.bfloat16)
    b4 = jnp.pad(params["b4"], ((0, 0), (0, PADDED_OUT - OUTPUT_SIZE)))

    weights = (w1, b1, w2, b2, w3, b3, w4, b4)
    weight_bytes = sum(int(a.size) * a.dtype.itemsize for a in weights)

    def full_spec(shape):
        # Whole array resident in VMEM; constant block index -> fetched once,
        # not re-DMAed per grid step.
        return pl.BlockSpec(shape, lambda i: tuple(0 for _ in shape))

    cost = pl.CostEstimate(
        flops=2 * B_pad * (INPUT_SIZE * 256 + 256 * 128 + 128 * 128
                           + 128 * PADDED_OUT),
        transcendentals=B_pad * 128,  # tanh
        bytes_accessed=B_pad * (INPUT_SIZE * 4 + PADDED_OUT * 2) + weight_bytes,
    )

    out_padded = pl.pallas_call(
        _mlp_kernel,
        out_shape=jax.ShapeDtypeStruct((B_pad, PADDED_OUT), jnp.bfloat16),
        grid=grid,
        in_specs=[
            pl.BlockSpec((batch_tile, INPUT_SIZE), lambda i: (i, 0)),
            full_spec(w1.shape), full_spec(b1.shape),
            full_spec(w2.shape), full_spec(b2.shape),
            full_spec(w3.shape), full_spec(b3.shape),
            full_spec(w4.shape), full_spec(b4.shape),
        ],
        out_specs=pl.BlockSpec((batch_tile, PADDED_OUT), lambda i: (i, 0)),
        compiler_params=pltpu.CompilerParams(
            dimension_semantics=("parallel",),
            vmem_limit_bytes=_vmem_limit_bytes(batch_tile, weight_bytes),
        ),
        cost_estimate=cost,
    )(x, *weights)

    # Slice off the batch padding and the lane padding of the last layer,
    # returning f32 to match the PyTorch module's output dtype.
    return out_padded[:B, :OUTPUT_SIZE].astype(jnp.float32)


def init_params(key):
    """Deterministic init mirroring nn.Linear's U(-1/sqrt(in), 1/sqrt(in)).

    Weights are stored pre-transposed as [in, out]; biases as [1, out].
    """
    dims = [INPUT_SIZE, *HIDDEN_SIZES, OUTPUT_SIZE]
    params = {}
    for idx in range(4):
        fan_in, fan_out = dims[idx], dims[idx + 1]
        key, kw, kb = jax.random.split(key, 3)
        bound = 1.0 / math.sqrt(fan_in)
        params[f"w{idx + 1}"] = jax.random.uniform(
            kw, (fan_in, fan_out), jnp.float32, minval=-bound, maxval=bound)
        params[f"b{idx + 1}"] = jax.random.uniform(
            kb, (1, fan_out), jnp.float32, minval=-bound, maxval=bound)
    return params


def mlp_reference(x, params):
    h = jnp.maximum(x @ params["w1"] + params["b1"], 0.0)
    h = jnp.tanh(h @ params["w2"] + params["b2"])
    h = jnp.maximum(h @ params["w3"] + params["b3"], 0.0)
    return h @ params["w4"] + params["b4"]


if __name__ == "__main__":
    key = jax.random.PRNGKey(0)
    key, kx = jax.random.split(key)
    # Small deterministic test: 16 rows; the default tile clamp picks an 8-row
    # tile -> 2 grid steps, exercising pipelining, the parallel grid axis, the
    # bf16 matmul path and the padded bf16 output slab.
    batch = 16
    x = jax.random.normal(kx, (batch, INPUT_SIZE), jnp.float32)
    params = init_params(key)

    out = mlp_forward(x, params)
    out = jax.block_until_ready(out)

    ref = mlp_reference(x, params)
    assert out.shape == (batch, OUTPUT_SIZE)
    # bf16 matmuls + bf16 output slab -> relaxed tolerance vs the f32 reference.
    assert jnp.allclose(out, ref, atol=3e-2, rtol=3e-2), (
        float(jnp.max(jnp.abs(out - ref))))

    print("KERNEL_OK")
</pallas_src>

<mosaic_0001>
module attributes {stable_mosaic.version = 11 : i64} {
  func.func @_mlp_kernel(%arg0: i32, %arg1: memref<8x50xf32, #tpu.memory_space<vmem>>, %arg2: memref<50x256xbf16, #tpu.memory_space<vmem>>, %arg3: memref<1x256xf32, #tpu.memory_space<vmem>>, %arg4: memref<256x128xbf16, #tpu.memory_space<vmem>>, %arg5: memref<1x128xf32, #tpu.memory_space<vmem>>, %arg6: memref<128x128xbf16, #tpu.memory_space<vmem>>, %arg7: memref<1x128xf32, #tpu.memory_space<vmem>>, %arg8: memref<128x128xbf16, #tpu.memory_space<vmem>>, %arg9: memref<1x128xf32, #tpu.memory_space<vmem>>, %arg10: memref<8x128xbf16, #tpu.memory_space<vmem>>) attributes {dimension_semantics = [#tpu.dimension_semantics<parallel>], iteration_bounds = array<i64: 2>, scalar_prefetch = 0 : i64, scratch_operands = 0 : i64, tpu.core_type = #tpu.core_type<tc>, window_params = [{transform_indices = @transform_0, window_bounds = array<i64: 8, 50>}, {pipeline_mode = #tpu.pipeline_mode<synchronous>, transform_indices = @transform_1, window_bounds = array<i64: 50, 256>}, {pipeline_mode = #tpu.pipeline_mode<synchronous>, transform_indices = @transform_2, window_bounds = array<i64: 1, 256>}, {pipeline_mode = #tpu.pipeline_mode<synchronous>, transform_indices = @transform_3, window_bounds = array<i64: 256, 128>}, {pipeline_mode = #tpu.pipeline_mode<synchronous>, transform_indices = @transform_4, window_bounds = array<i64: 1, 128>}, {pipeline_mode = #tpu.pipeline_mode<synchronous>, transform_indices = @transform_5, window_bounds = array<i64: 128, 128>}, {pipeline_mode = #tpu.pipeline_mode<synchronous>, transform_indices = @transform_6, window_bounds = array<i64: 1, 128>}, {pipeline_mode = #tpu.pipeline_mode<synchronous>, transform_indices = @transform_7, window_bounds = array<i64: 128, 128>}, {pipeline_mode = #tpu.pipeline_mode<synchronous>, transform_indices = @transform_8, window_bounds = array<i64: 1, 128>}, {transform_indices = @transform_9, window_bounds = array<i64: 8, 128>}]} {
    %c0 = arith.constant 0 : index
    %c0_0 = arith.constant 0 : index
    %0 = vector.load %arg1[%c0, %c0_0] : memref<8x50xf32, #tpu.memory_space<vmem>>, vector<8x50xf32>
    %1 = arith.truncf %0 : vector<8x50xf32> to vector<8x50xbf16>
    %c0_1 = arith.constant 0 : index
    %c0_2 = arith.constant 0 : index
    %2 = vector.load %arg2[%c0_1, %c0_2] : memref<50x256xbf16, #tpu.memory_space<vmem>>, vector<50x256xbf16>
    %cst = arith.constant dense<0.000000e+00> : vector<8x256xf32>
    %3 = tpu.matmul %1, %2, %cst {dimension_numbers = #tpu.dot_dimension_numbers<[1], [0], [0], [1], [0, 0, 1, 1], [], []>} : vector<8x50xbf16>, vector<50x256xbf16>, vector<8x256xf32> -> vector<8x256xf32>
    %c0_3 = arith.constant 0 : index
    %c0_4 = arith.constant 0 : index
    %4 = vector.load %arg3[%c0_3, %c0_4] : memref<1x256xf32, #tpu.memory_space<vmem>>, vector<1x256xf32>
    %5 = vector.broadcast %4 : vector<1x256xf32> to vector<8x256xf32>
    %6 = arith.addf %3, %5 : vector<8x256xf32>
    %cst_5 = arith.constant 0.000000e+00 : f32
    %7 = vector.broadcast %cst_5 : f32 to vector<8x256xf32>
    %8 = arith.maximumf %6, %7 : vector<8x256xf32>
    %9 = arith.truncf %8 : vector<8x256xf32> to vector<8x256xbf16>
    %c0_6 = arith.constant 0 : index
    %c0_7 = arith.constant 0 : index
    %10 = vector.load %arg4[%c0_6, %c0_7] : memref<256x128xbf16, #tpu.memory_space<vmem>>, vector<256x128xbf16>
    %cst_8 = arith.constant dense<0.000000e+00> : vector<8x128xf32>
    %11 = tpu.matmul %9, %10, %cst_8 {dimension_numbers = #tpu.dot_dimension_numbers<[1], [0], [0], [1], [0, 0, 1, 1], [], []>} : vector<8x256xbf16>, vector<256x128xbf16>, vector<8x128xf32> -> vector<8x128xf32>
    %c0_9 = arith.constant 0 : index
    %c0_10 = arith.constant 0 : index
    %12 = vector.load %arg5[%c0_9, %c0_10] : memref<1x128xf32, #tpu.memory_space<vmem>>, vector<1x128xf32>
    %13 = vector.broadcast %12 : vector<1x128xf32> to vector<8x128xf32>
    %14 = arith.addf %11, %13 : vector<8x128xf32>
    %15 = math.tanh %14 : vector<8x128xf32>
    %16 = arith.truncf %15 : vector<8x128xf32> to vector<8x128xbf16>
    %c0_11 = arith.constant 0 : index
    %c0_12 = arith.constant 0 : index
    %17 = vector.load %arg6[%c0_11, %c0_12] : memref<128x128xbf16, #tpu.memory_space<vmem>>, vector<128x128xbf16>
    %cst_13 = arith.constant dense<0.000000e+00> : vector<8x128xf32>
    %18 = tpu.matmul %16, %17, %cst_13 {dimension_numbers = #tpu.dot_dimension_numbers<[1], [0], [0], [1], [0, 0, 1, 1], [], []>} : vector<8x128xbf16>, vector<128x128xbf16>, vector<8x128xf32> -> vector<8x128xf32>
    %c0_14 = arith.constant 0 : index
    %c0_15 = arith.constant 0 : index
    %19 = vector.load %arg7[%c0_14, %c0_15] : memref<1x128xf32, #tpu.memory_space<vmem>>, vector<1x128xf32>
    %20 = vector.broadcast %19 : vector<1x128xf32> to vector<8x128xf32>
    %21 = arith.addf %18, %20 : vector<8x128xf32>
    %cst_16 = arith.constant 0.000000e+00 : f32
    %22 = vector.broadcast %cst_16 : f32 to vector<8x128xf32>
    %23 = arith.maximumf %21, %22 : vector<8x128xf32>
    %24 = arith.truncf %23 : vector<8x128xf32> to vector<8x128xbf16>
    %c0_17 = arith.constant 0 : index
    %c0_18 = arith.constant 0 : index
    %25 = vector.load %arg8[%c0_17, %c0_18] : memref<128x128xbf16, #tpu.memory_space<vmem>>, vector<128x128xbf16>
    %cst_19 = arith.constant dense<0.000000e+00> : vector<8x128xf32>
    %26 = tpu.matmul %24, %25, %cst_19 {dimension_numbers = #tpu.dot_dimension_numbers<[1], [0], [0], [1], [0, 0, 1, 1], [], []>} : vector<8x128xbf16>, vector<128x128xbf16>, vector<8x128xf32> -> vector<8x128xf32>
    %c0_20 = arith.constant 0 : index
    %c0_21 = arith.constant 0 : index
    %27 = vector.load %arg9[%c0_20, %c0_21] : memref<1x128xf32, #tpu.memory_space<vmem>>, vector<1x128xf32>
    %28 = vector.broadcast %27 : vector<1x128xf32> to vector<8x128xf32>
    %29 = arith.addf %26, %28 : vector<8x128xf32>
    %30 = arith.truncf %29 : vector<8x128xf32> to vector<8x128xbf16>
    %c0_22 = arith.constant 0 : index
    %c0_23 = arith.constant 0 : index
    %31 = vector.load %arg10[%c0_22, %c0_23] : memref<8x128xbf16, #tpu.memory_space<vmem>>, vector<8x128xbf16>
    tpu.vector_store %arg10[%c0_22, %c0_23], %30 {strides = array<i32>} : memref<8x128xbf16, #tpu.memory_space<vmem>>, vector<8x128xbf16>,
    return
  }
  func.func @transform_0(%arg0: i32) -> (i32, i32) {
    %c0_i32 = arith.constant 0 : i32
    %c0_i32_0 = arith.constant 0 : i32
    return %arg0, %c0_i32 : i32, i32
  }
  func.func @transform_1(%arg0: i32) -> (i32, i32) {
    %c0_i32 = arith.constant 0 : i32
    %c0_i32_0 = arith.constant 0 : i32
    %c0_i32_1 = arith.constant 0 : i32
    return %c0_i32, %c0_i32_0 : i32, i32
  }
  func.func @transform_2(%arg0: i32) -> (i32, i32) {
    %c0_i32 = arith.constant 0 : i32
    %c0_i32_0 = arith.constant 0 : i32
    %c0_i32_1 = arith.constant 0 : i32
    return %c0_i32, %c0_i32_0 : i32, i32
  }
  func.func @transform_3(%arg0: i32) -> (i32, i32) {
    %c0_i32 = arith.constant 0 : i32
    %c0_i32_0 = arith.constant 0 : i32
    %c0_i32_1 = arith.constant 0 : i32
    return %c0_i32, %c0_i32_0 : i32, i32
  }
  func.func @transform_4(%arg0: i32) -> (i32, i32) {
    %c0_i32 = arith.constant 0 : i32
    %c0_i32_0 = arith.constant 0 : i32
    %c0_i32_1 = arith.constant 0 : i32
    return %c0_i32, %c0_i32_0 : i32, i32
  }
  func.func @transform_5(%arg0: i32) -> (i32, i32) {
    %c0_i32 = arith.constant 0 : i32
    %c0_i32_0 = arith.constant 0 : i32
    %c0_i32_1 = arith.constant 0 : i32
    return %c0_i32, %c0_i32_0 : i32, i32
  }
  func.func @transform_6(%arg0: i32) -> (i32, i32) {
    %c0_i32 = arith.constant 0 : i32
    %c0_i32_0 = arith.constant 0 : i32
    %c0_i32_1 = arith.constant 0 : i32
    return %c0_i32, %c0_i32_0 : i32, i32
  }
  func.func @transform_7(%arg0: i32) -> (i32, i32) {
    %c0_i32 = arith.constant 0 : i32
    %c0_i32_0 = arith.constant 0 : i32
    %c0_i32_1 = arith.constant 0 : i32
    return %c0_i32, %c0_i32_0 : i32, i32
  }
  func.func @transform_8(%arg0: i32) -> (i32, i32) {
    %c0_i32 = arith.constant 0 : i32
    %c0_i32_0 = arith.constant 0 : i32
    %c0_i32_1 = arith.constant 0 : i32
    return %c0_i32, %c0_i32_0 : i32, i32
  }
  func.func @transform_9(%arg0: i32) -> (i32, i32) {
    %c0_i32 = arith.constant 0 : i32
    %c0_i32_0 = arith.constant 0 : i32
    return %arg0, %c0_i32 : i32, i32
  }
}

</mosaic_0001>

<bundles_post_ra>
// kernel: tpu_custom_call.1
= control target key start
LH: loop header
LB: loop body
LE: loop exit
PB: predicated region body
PF: predicated region fallthrough
CT: control target
= control target key end

     0   :  { %s1928_s0 = inlined_call_operand.hbm [shape: f32[16,50], index: 0, kind: input, shape index: {}]   ;;  %s1929_s1 = inlined_call_operand.hbm [shape: bf16[50,256], index: 1, kind: input, shape index: {}]   ;;  %s1930_s2 = inlined_call_operand.vmem [shape: f32[1,256], index: 2, kind: input, shape index: {}]   ;;  %s1931_s3 = inlined_call_operand.hbm [shape: bf16[256,128], index: 3, kind: input, shape index: {}]   ;;  %s1932_s4 = inlined_call_operand.vmem [shape: f32[1,128], index: 4, kind: input, shape index: {}]   ;;  %s1933_s5 = inlined_call_operand.hbm [shape: bf16[128,128], index: 5, kind: input, shape index: {}]   ;;  %s1934_s6 = inlined_call_operand.vmem [shape: f32[1,128], index: 6, kind: input, shape index: {}]   ;;  %s1935_s7 = inlined_call_operand.hbm [shape: bf16[128,128], index: 7, kind: input, shape index: {}]   ;;  %s1936_s8 = inlined_call_operand.vmem [shape: f32[1,128], index: 8, kind: input, shape index: {}]   ;;  %s1937_s9 = inlined_call_operand.hbm [shape: bf16[16,128], index: 9, kind: output, shape index: {}]  }
   0x1   :  { %1942 = sst [smem:[#allocation16_spill]] %s1929_s1 }
   0x2   :  { %1943 = sst [smem:[#allocation17_spill]] %s1937_s9 }
   0x3   :  { %14 = vsyncpa [#allocation3], 0 }
   0x4   :  { %16 = vsyncpa [#allocation3 + $0x1], 0 }
   0x5   :  { %17 = vsyncpa [#allocation6], 0 }
   0x6   :  { %18 = vsyncpa [#allocation9], 0 }
   0x7   :  { %19 = vsyncpa [#allocation4], 0 }
   0x8   :  { %21 = vsyncpa [#allocation4 + $0x1], 0  ;;  %s1609_s30 = smov 0   ;;  %s1611_s10 = smov 0  }
   0x9   :  { %s1613_s11 = smov 0   ;;  %s1615_s12 = smov 0  }
   0xa LB: > { %s1546_s13 = smov [#allocation5]   ;;  %s1630_s15 = sadd.s32 4294967295, %s1544_s12   ;;  %s1544_s12 = sphi %s1615_s12, %s1966_s12   ;;  %s1540_s11 = sphi %s1613_s11, %s1965_s11   ;;  %s1536_s10 = sphi %s1611_s10, %s1964_s10   ;;  %s1532_s30 = sphi %s1609_s30, %s1963_s30  }
   0xb   : > { %s264_s14 = sshll.u32 %s1546_s13, 4  ;;  %p1045_p0 = scmp.ge.s32.totalorder %s1544_s12, 1  ;;  %s1635_s14 = int_to_ptr.vmem [resolvable:$true] %s264_s14 }
   0xc   : > { %p1939_p1 = scmp.eq.s32.totalorder %s1630_s15, 0  ;;  %p252_p2 = scmp.lt.s32.totalorder %s1544_s12, 3 }
   0xd   : > { %s1547_s18 = smov [#allocation8]   ;;  %s1548_s20 = smov [#allocation7]  }
   0xe   : > { %p1637_p3 = pnand %p1045_p0, %p252_p2  ;;  %s296_s19 = sshll.u32 %s1547_s18, 4  ;;  %s1650_s19 = int_to_ptr.vmem [resolvable:$true] %s296_s19 }
   0xf   : > { %s1652_s21 = sshll.u32 %s1548_s20, 4  ;;  %s1946_s1 = sld [smem:[#allocation16_spill]]  ;;  %s281_s21 = int_to_ptr.vmem [resolvable:$true] %s1652_s21 }
  0x10   : > { %s1944_s16 = scalar_select %p1637_p3, 1, 0 }
  0x11   : > { %p1209_p5 = pneg %p1637_p3 }
  0x13   : > { %p1646_p6 = pnand %p1209_p5, %p1939_p1 }
  0x15   : > { %s1328_s24 = scalar_lea.hbm %s1946_s1, 896  ;;  %p1662_p8 = pneg %p1646_p6 }
  0x16   : > { %p1329_p7 = scmp.ne.s32.totalorder %s1946_s1, %s1328_s24  ;;  %p1335_p11 = scmp.lt.u32.totalorder %s1328_s24, %s1946_s1 }
  0x18   : > { %p1331_p9 = pnand %p1662_p8, %p1329_p7 }
  0x1a   : > { %p1332_p10 = pneg %p1331_p9 }
  0x1c   : > { %p1337_p12 = pnand %p1335_p11, %p1332_p10 }
  0x1e   : > { %1340 = shalt.err (!%p1337_p12)
}
  0x1f   : > { %s1341_s13 = scalar_lea.vmem %s1635_s14, 896  ;;  %p1349_p5 = scmp.lt.s32.totalorder %s1635_s14, %s1635_s14 }
  0x20   : > { %p1342_p13 = scmp.ne.s32.totalorder %s1635_s14, %s1341_s13  ;;  %p1350_p4 = scmp.lt.s32.totalorder %s1341_s13, %s1341_s13 }
  0x22   : > { %p1344_p0 = pnand %p1342_p13, %p1662_p8  ;;  %p1351_p7 = por %p1350_p4, %p1349_p5 }
  0x24   : > { %p1345_p2 = pneg %p1344_p0 }
  0x26   : > { %p1352_p9 = pnand %p1351_p7, %p1345_p2 }
  0x28   : > { %1355 = shalt.err (!%p1352_p9)
}
  0x29   : > { %s1549_s18 = smov 128   ;;  %s1550_s20 = smov 8  }
  0x2a   : > { %1212 = dma.hbm_to_vmem [thread:$0]  (!%p1646_p6), %s1946_s1, 896, %s1635_s14, [#allocation6], %s1549_s18, %s1549_s18, %s1550_s20  }
  0x2b   : > { %s1356_s26 = scalar_lea.hbm %s1933_s5, 1024 }
  0x2c   : > { %p1357_p4 = scmp.ne.s32.totalorder %s1933_s5, %s1356_s26  ;;  %p1363_p12 = scmp.lt.u32.totalorder %s1356_s26, %s1933_s5 }
  0x2e   : > { %p1359_p10 = pnand %p1357_p4, %p1662_p8 }
  0x30   : > { %p1360_p11 = pneg %p1359_p10 }
  0x32   : > { %p1365_p13 = pnand %p1363_p12, %p1360_p11 }
  0x34   : > { %1368 = shalt.err (!%p1365_p13)
}
  0x35   : > { %s1369_s14 = scalar_lea.vmem %s1650_s19, 1024  ;;  %p1377_p7 = scmp.lt.s32.totalorder %s1650_s19, %s1650_s19 }
  0x36   : > { %p1370_p0 = scmp.ne.s32.totalorder %s1650_s19, %s1369_s14  ;;  %p1378_p9 = scmp.lt.s32.totalorder %s1369_s14, %s1369_s14 }
  0x38   : > { %p1372_p2 = pnand %p1370_p0, %p1662_p8  ;;  %p1379_p4 = por %p1378_p9, %p1377_p7 }
  0x3a   : > { %p1373_p5 = pneg %p1372_p2 }
  0x3c   : > { %p1380_p10 = pnand %p1379_p4, %p1373_p5 }
  0x3e   : > { %1383 = shalt.err (!%p1380_p10)
}
  0x3f   : > { %s1551_s18 = smov 64   ;;  %s1552_s9 = smov 4  }
  0x40   : > { %1218 = dma.hbm_to_vmem [thread:$0]  (!%p1646_p6), %s1933_s5, 1024, %s1650_s19, [#allocation9], %s1551_s18, %s1551_s18, %s1552_s9  }
  0x41   : > { %s1384_s25 = scalar_lea.hbm %s1931_s3, 2048 }
  0x42   : > { %p1385_p11 = scmp.ne.s32.totalorder %s1931_s3, %s1384_s25  ;;  %p1391_p0 = scmp.lt.u32.totalorder %s1384_s25, %s1931_s3 }
  0x44   : > { %p1387_p12 = pnand %p1385_p11, %p1662_p8 }
  0x46   : > { %p1388_p13 = pneg %p1387_p12 }
  0x48   : > { %p1393_p2 = pnand %p1391_p0, %p1388_p13 }
  0x4a   : > { %1396 = shalt.err (!%p1393_p2)
}
  0x4b   : > { %s1397_s14 = scalar_lea.vmem %s281_s21, 2048  ;;  %p1405_p4 = scmp.lt.s32.totalorder %s281_s21, %s281_s21 }
  0x4c   : > { %p1398_p5 = scmp.ne.s32.totalorder %s281_s21, %s1397_s14  ;;  %p1406_p10 = scmp.lt.s32.totalorder %s1397_s14, %s1397_s14 }
  0x4e   : > { %p1400_p7 = pnand %p1398_p5, %p1662_p8  ;;  %p1407_p1 = por %p1406_p10, %p1405_p4 }
  0x50   : > { %p1401_p9 = pneg %p1400_p7 }
  0x52   : > { %p1408_p3 = pnand %p1407_p1, %p1401_p9 }
  0x54   : > { %1411 = shalt.err (!%p1408_p3)
}
  0x55   : > { %1215 = dma.hbm_to_vmem [thread:$0]  (!%p1646_p6), %s1931_s3, 2048, %s281_s21, [#allocation6], %s1551_s18, %s1551_s18, %s1552_s9  }
  0x56   : > { %s1553_s22 = smov [#allocation10]   ;;  %s1412_s26 = scalar_lea.hbm %s1935_s7, 1024 }
  0x57   : > { %s312_s23 = sshll.u32 %s1553_s22, 4  ;;  %p1413_p1 = scmp.ne.s32.totalorder %s1935_s7, %s1412_s26  ;;  %s313_s23 = int_to_ptr.vmem [resolvable:$true] %s312_s23 }
  0x58   : > { %p1419_p12 = scmp.lt.u32.totalorder %s1412_s26, %s1935_s7 }
  0x59   : > { %p1415_p3 = pnand %p1413_p1, %p1662_p8 }
  0x5b   : > { %p1416_p11 = pneg %p1415_p3 }
  0x5d   : > { %p1421_p13 = pnand %p1419_p12, %p1416_p11 }
  0x5f   : > { %1424 = shalt.err (!%p1421_p13)
}
  0x60   : > { %s1425_s21 = scalar_lea.vmem %s313_s23, 1024  ;;  %p1433_p7 = scmp.lt.s32.totalorder %s313_s23, %s313_s23 }
  0x61   : > { %p1426_p0 = scmp.ne.s32.totalorder %s313_s23, %s1425_s21  ;;  %p1434_p9 = scmp.lt.s32.totalorder %s1425_s21, %s1425_s21 }
  0x63   : > { %p1428_p2 = pnand %p1426_p0, %p1662_p8  ;;  %p1435_p4 = por %p1434_p9, %p1433_p7 }
  0x65   : > { %p1429_p5 = pneg %p1428_p2 }
  0x67   : > { %p1436_p10 = pnand %p1435_p4, %p1429_p5 }
  0x69   : > { %1439 = shalt.err (!%p1436_p10)
}
  0x6a   : > { %1221 = dma.hbm_to_vmem [thread:$0]  (!%p1646_p6), %s1935_s7, 1024, %s313_s23, [#allocation9], %s1551_s18, %s1551_s18, %s1552_s9  }
  0x6b   : > { %s1044_s17 = sadd.s32 4294967294, %s1544_s12   ;;  %s1754_s27 = sadd.s32 1, %s1544_s12  }
  0x6c   : > { %s31_s22 = ssub.s32 %s1544_s12, %s1754_s27  ;;  %s34_s24 = sadd.s32 1, %s1540_s11 }
  0x6d   : > { %p32_p8 = scmp.eq.s32.totalorder %s31_s22, 0  ;;  %p41_p1 = scmp.ne.s32.totalorder %s1540_s11, %s1536_s10 }
  0x6e   : > { %p42_p3 = scmp.eq.s32.totalorder %s1544_s12, 0  ;;  %p47_p11 = scmp.ne.s32.totalorder %s1536_s10, %s1532_s30 }
  0x6f   : > { %s1765_s25 = scalar_select %p32_p8, %s1540_s11, %s34_s24  }
  0x70   : > { %p1767_p12 = por %p42_p3, %p41_p1  ;;  %p1949_p13 = scmp.eq.s32.totalorder %s1630_s15, 0 }
  0x71   : > { %p239_p0 = scmp.eq.s32.totalorder %s1630_s15, 1  ;;  %p245_p2 = scmp.eq.s32.totalorder %s1044_s17, 1 }
  0x72   : > { %p1773_p6 = por %p1949_p13, %p47_p11  ;;  %p1234_p5 = scmp.lt.s32.totalorder %s1544_s12, 2 }
  0x73   : > { %s329_s9 = sand.u32 1, %s1540_s11   ;;  %p1780_p7 = por %p239_p0, %p41_p1 }
  0x74   : > { %p1784_p9 = por %p245_p2, %p47_p11  ;;  %s1051_s29 = sshll.u32 %s329_s9, 3 }
  0x75   : > { %s1951_s23 = scalar_select %p1780_p7, 1, 0 }
  0x76   : > { %s1952_s28 = scalar_select %p1784_p9, 1, 0 }
  0x77   : > { %s1052_s13 = sshll.u32 %s1544_s12, 7  ;;  %s333_s20 = scalar_lea.vmem [#allocation2], %s1051_s29 }
  0x78   : > { %s1792_s19 = scalar_lea.hbm %s1928_s0, %s1052_s13  ;;  %s340_s17 = sshll.u32 %s333_s20, 4  ;;  %s1794_s17 = int_to_ptr.vmem [resolvable:$true] %s340_s17 }
  0x79   : > { %p1798_p4 = pnand %p1234_p5, %p1767_p12  ;;  %s330_s24 = scalar_lea.sflag [#allocation3], %s329_s9 }
  0x7a   : > { %s1440_s1 = scalar_lea.hbm %s1792_s19, 128  ;;  %s1445_s14 = scalar_lea.hbm %s1928_s0, 256 }
  0x7b   : > { %p1441_p10 = scmp.ne.s32.totalorder %s1792_s19, %s1440_s1  ;;  %p1442_p8 = pneg %p1798_p4 }
  0x7c   : > { %p1446_p11 = scmp.lt.u32.totalorder %s1792_s19, %s1928_s0  ;;  %p1447_p12 = scmp.lt.u32.totalorder %s1445_s14, %s1440_s1 }
  0x7d   : > { %p1443_p1 = pnand %p1442_p8, %p1441_p10  ;;  %p1449_p0 = scmp.lt.u32.totalorder %s1440_s1, %s1792_s19 }
  0x7e   : > { %p1448_p13 = por %p1447_p12, %p1446_p11 }
  0x7f   : > { %p1444_p3 = pneg %p1443_p1 }
  0x80   : > { %p1450_p2 = por %p1449_p0, %p1448_p13 }
  0x82   : > { %p1451_p5 = pnand %p1450_p2, %p1444_p3 }
  0x84   : > { %1454 = shalt.err (!%p1451_p5)
}
  0x85   : > { %s1455_s9 = scalar_lea.vmem %s1794_s17, 128  ;;  %s1554_s20 = smov [#allocation2]  }
  0x86   : > { %p1456_p10 = scmp.ne.s32.totalorder %s1794_s17, %s1455_s9  ;;  %s1460_s29 = sshll.u32 %s1554_s20, 4  ;;  %s1461_s29 = int_to_ptr.vmem [resolvable:$false] %s1460_s29 }
  0x87   : > { %s1462_s13 = scalar_lea.vmem %s1461_s29, 256  ;;  %p1463_p7 = scmp.lt.s32.totalorder %s1794_s17, %s1461_s29 }
  0x88   : > { %p1458_p1 = pnand %p1456_p10, %p1442_p8  ;;  %p1464_p11 = scmp.lt.s32.totalorder %s1462_s13, %s1455_s9 }
  0x8a   : > { %p1459_p9 = pneg %p1458_p1  ;;  %p1465_p12 = por %p1464_p11, %p1463_p7 }
  0x8c   : > { %p1466_p13 = pnand %p1465_p12, %p1459_p9 }
  0x8e   : > { %1469 = shalt.err (!%p1466_p13)
}
  0x8f   : > { %1225 = dma.hbm_to_vmem [thread:$0]  (!%p1798_p4), %s1792_s19, 128, %s1794_s17, %s330_s24  }
  0x90   : > { %p1954_p3 = scmp.ne.s32.totalorder %s1944_s16, 0 }
  0x91   : > { %s1830_s1 = sand.u32 (!%p1954_p3), 1, %s1536_s10  }
  0x92   : > { %349 = sbr.rel (%p1954_p3) target bundleno = 1075 (0x433), region = 56  ;;  %s1054_s14 = sshll.u32 (!%p1954_p3), %s1830_s1, 3 }
  0x93   : > { %s352_s26 = scalar_lea.sflag (!%p1954_p3), [#allocation3], %s1830_s1  ;;  %s1834_s21 = scalar_lea.vmem (!%p1954_p3), [#allocation2], %s1054_s14 }
  0x99   : > { %1515 = dma.done.wait (%p1773_p6), %s352_s26, 128  }
  0x9a   : > { %1517 = vsyncadd (%p1773_p6), %s352_s26, 4294967168  ;;  %p1955_p7 = scmp.eq.s32.totalorder %s1630_s15, 0 }
  0x9c   : > { %1519 = dma.done.wait (%p1955_p7), [#allocation6], 2944   ;;  %p1956_p9 = pmov %p1955_p7 }
  0x9d   : > { %p1957_p4 = pmov %p1955_p7 }
  0x9e   : > { %1521 = vsyncadd (%p1956_p9), [#allocation6], 4294964352 }
  0x9f   : > { %1523 = dma.done.wait (%p1957_p4), [#allocation9], 2048   ;;  %p1958_p8 = pmov %p1957_p4 }
  0xa0   : > { %v1555_v0 = vmov 0   ;;  %v1283_v1 = vld [vmem:[#allocation5 + $0x4] ss:$8 sps:$4 sm:$0xff]   ;;  %v1285_v2 = vld [vmem:[#allocation5] ss:$8 sps:$4 sm:$0xff]   ;;  %v1294_v8 = vld [vmem:[#allocation7 + $0x40] sm:$0xff]   ;;  %v418_v33 = vlaneseq }
  0xa1   : > { %1525 = vsyncadd (%p1958_p8), [#allocation9], 4294965248  ;;  %506 = vmatprep.mubr.bf16.mxu0 %v1555_v0  ;;  %474 = vmatprep.subr.bf16.mxu0 %v1283_v1  ;;  %v1286_v3 = vld [vmem:[#allocation5 + $0x14] ss:$8 sps:$4 sm:$0xff]   ;;  %v1288_v4 = vld [vmem:[#allocation5 + $0x10] ss:$8 sps:$4 sm:$0xff]  }
  0xa2   : > { %475 = vmatpush1.bf16.msra.mxu0 %v1285_v2  ;;  %v1289_v5 = vld [vmem:[#allocation5 + $0x24] ss:$8 sps:$4 sm:$0xff]   ;;  %v415_v6 = vld [vmem:[#allocation5 + $0x30] sm:$0x11]  ;;  %v1291_v7 = vld [vmem:[#allocation5 + $0x20] ss:$8 sps:$4 sm:$0xff]   ;;  %1109 = vmatprep.subr.bf16.mxu1 %v1294_v8 }
  0xa3   : > { %476 = vmatprep.subr.bf16.mxu0 %v1286_v3  ;;  %v1295_v9 = vld [vmem:[#allocation7] sm:$0xff]   ;;  %v1296_v10 = vld [vmem:[#allocation7 + $0x48] sm:$0xff]   ;;  %v1067_v11 = vcombine.high %v415_v6, %v415_v6  ;;  %v1066_v12 = vcombine.low %v415_v6, %v415_v6  ;;  %vm467_vm0 = vcmask 1040384   ;;  %v1298_v14 = vld [vmem:[#allocation7 + $0x50] sm:$0xff]   ;;  %vm463_vm1 = vcmask 408576   ;;  %s1059_s9 = sshll.u32 %s1830_s1, 2 }
  0xa4   : > { %1110 = vmatpush3.bf16.msra.mxu1 %v1295_v9  ;;  %v1297_v13 = vld [vmem:[#allocation7 + $0x8] sm:$0xff]   ;;  %v407_v15 = vld [vmem:[%s1834_s21] sm:$0xff]  ;;  %v1299_v17 = vld [vmem:[#allocation7 + $0x10] sm:$0xff]   ;;  %v1556_v30 = vmov 0.0   ;;  %v419_v34 = vshrl.u32 %v418_v33, 7  ;;  %vm1557_vm2 = vmmov 0  }
  0xa5   : > { %1111 = vmatprep.subr.bf16.mxu1 %v1296_v10  ;;  %v469_v16 = vsel %vm467_vm0, %v1066_v12, 0  ;;  %v1300_v18 = vld [vmem:[#allocation7 + $0x58] sm:$0xff]   ;;  %v408_v19 = vpack.c.bf16 %v407_v15, %v407_v15  ;;  %v1302_v21 = vld [vmem:[#allocation7 + $0x60] sm:$0xff]   ;;  %v1304_v23 = vld [vmem:[#allocation7 + $0x68] sm:$0xff]   ;;  %s1106_s13 = sshll.u32 %s1630_s15, 6  ;;  %s405_s14 = scalar_lea.vmem [#allocation11], %s1059_s9 }
  0xa6   : > { %477 = vmatpush1.bf16.msra.mxu0 %v1288_v4  ;;  %v1301_v20 = vld [vmem:[#allocation7 + $0x18] sm:$0xff]   ;;  %v1303_v22 = vld [vmem:[#allocation7 + $0x20] sm:$0xff]   ;;  %v1305_v24 = vld [vmem:[#allocation7 + $0x28] sm:$0xff]   ;;  %v420_v35 = vsub.s32 0, %v419_v34  ;;  %v424_v37 = vsub.s32 1, %v419_v34  ;;  %s936_s26 = sshll.u32 %s405_s14, 4  ;;  %s1886_s26 = int_to_ptr.vmem [resolvable:$true] %s936_s26 }
  0xa7   : > { %478 = vmatprep.subr.bf16.mxu0 %v1289_v5  ;;  %v1306_v25 = vld [vmem:[#allocation7 + $0x70] sm:$0xff]   ;;  %v1308_v27 = vld [vmem:[#allocation7 + $0x78] sm:$0xff]   ;;  %v1310_v29 = vld [vmem:[#allocation8] sm:$0xff]   ;;  %s1959_s18 = sld [smem:[#allocation17_spill]]  ;;  %s923_s17 = scalar_lea.sflag [#allocation4], %s1830_s1 }
  0xa8   : > { %1112 = vmatpush3.bf16.msra.mxu1 %v1297_v13  ;;  %v1307_v26 = vld [vmem:[#allocation7 + $0x30] sm:$0xff]   ;;  %v1309_v28 = vld [vmem:[#allocation7 + $0x38] sm:$0xff]   ;;  %v1311_v31 = vld [vmem:[#allocation8 + $0x8] sm:$0xff]   ;;  %s1470_s15 = scalar_lea.vmem %s1886_s26, 64  ;;  %p1960_p0 = scmp.ne.s32.totalorder %s1951_s23, 0 }
  0xa9   : > { %1113 = vmatprep.subr.bf16.mxu1 %v1298_v14  ;;  %v1312_v32 = vld [vmem:[#allocation8 + $0x10] sm:$0xff]   ;;  %v416_v36 = vld [vmem:[%s1930_s2] sm:$0x3]  ;;  %v1314_v51 = vld [vmem:[#allocation8 + $0x20] sm:$0xff]   ;;  %p1471_p6 = scmp.ne.s32.totalorder %s1886_s26, %s1470_s15  ;;  %s1558_s22 = smov [#allocation11]  }
  0xaa   : > { %479 = vmatpush1.bf16.msra.mxu0 %v1291_v7  ;;  %v421_v38 = vrot.slane %v416_v36, %v420_v35  ;;  %v425_v39 = vrot.slane %v416_v36, %v424_v37  ;;  %v1313_v50 = vld [vmem:[#allocation8 + $0x18] sm:$0xff]   ;;  %v1315_v52 = vld [vmem:[#allocation8 + $0x28] sm:$0xff]   ;;  %v1316_v53 = vld [vmem:[#allocation8 + $0x30] sm:$0xff]   ;;  %s1474_s24 = sshll.u32 %s1558_s22, 4  ;;  %s1475_s24 = int_to_ptr.vmem [resolvable:$false] %s1474_s24 }
  0xab   : > { %1068 = vmatprep.subr.msk.bf16.mxu0 %vm467_vm0, %v1067_v11  ;;  %v1317_v54 = vld [vmem:[#allocation8 + $0x38] sm:$0xff]   ;;  %v1318_v55 = vld [vmem:[#allocation10] sm:$0xff]   ;;  %v1319_v56 = vld [vmem:[#allocation10 + $0x8] sm:$0xff]   ;;  %p1472_p2 = pnand %p1471_p6, %p1960_p0  ;;  %s1476_s9 = scalar_lea.vmem %s1475_s24, 128 }
  0xac   : > { %1114 = vmatpush3.bf16.msra.mxu1 %v1299_v17  ;;  %v1320_v57 = vld [vmem:[#allocation10 + $0x10] sm:$0xff]   ;;  %v1321_v58 = vld [vmem:[#allocation10 + $0x18] sm:$0xff]   ;;  %v1322_v59 = vld [vmem:[#allocation10 + $0x20] sm:$0xff]   ;;  %p1477_p10 = scmp.lt.s32.totalorder %s1886_s26, %s1475_s24  ;;  %p1478_p1 = scmp.lt.s32.totalorder %s1476_s9, %s1470_s15 }
  0xad   : > { %1115 = vmatprep.subr.bf16.mxu1 %v1300_v18  ;;  %v1323_v60 = vld [vmem:[#allocation10 + $0x28] sm:$0xff]   ;;  %v1070_v62 = vld [vmem:[%s1932_s4] ss:$0 sm:$0xff]  ;;  %v1324_v6 = vld [vmem:[#allocation10 + $0x30] sm:$0xff]   ;;  %s1884_s19 = scalar_lea.hbm %s1959_s18, %s1106_s13  ;;  %p1473_p5 = pneg %p1472_p2 }
  0xae   : > { %481 = vmatpush1.bf16.msra.mxu0 %v469_v16  ;;  %v1325_v7 = vld [vmem:[#allocation10 + $0x38] sm:$0xff]   ;;  %p1479_p11 = por %p1478_p1, %p1477_p10 }
  0xaf   : > { %1149 = vmatprep.subr.bf16.mxu0 %v1556_v30  ;;  %v1087_v8 = vld [vmem:[%s1934_s6] ss:$0 sm:$0xff] }
  0xb0   : > { %1116 = vmatpush3.bf16.msra.mxu1 %v1301_v20  ;;  %v1096_v16 = vld [vmem:[%s1936_s8] ss:$0 sm:$0xff]  ;;  %p1480_p12 = pnand %p1479_p11, %p1473_p5 }
  0xb1   : > { %1069 = vmatmul.mubr.msk.bf16.vlgmr.msra.gmra.mrb[0].mxu0 %vm463_vm1, %v408_v19  ;;  %1117 = vmatprep.subr.bf16.mxu1 %v1302_v21 }
  0xb2   : > { %1150 = vmatpush3.bf16.msra.mxu0 %v1310_v29  ;;  %1165 = vmatprep.mubr.msk.bf16.mxu0 %vm1557_vm2, %v1556_v30 }
  0xb3   : > { %1151 = vmatprep.subr.bf16.mxu0 %v1556_v30 }
  0xb4   : > { %1118 = vmatpush3.bf16.msra.mxu1 %v1303_v22 }
  0xb5   : > { %1119 = vmatprep.subr.bf16.mxu1 %v1304_v23 }
  0xb6   : > { %1152 = vmatpush3.bf16.msra.mxu0 %v1311_v31 }
  0xb7   : > { %1153 = vmatprep.subr.bf16.mxu0 %v1556_v30 }
  0xb8   : > { %1120 = vmatpush3.bf16.msra.mxu1 %v1305_v24 }
  0xb9   : > { %1121 = vmatprep.subr.bf16.mxu1 %v1306_v25 }
  0xba   : > { %1154 = vmatpush3.bf16.msra.mxu0 %v1312_v32 }
  0xbb   : > { %1155 = vmatprep.subr.bf16.mxu0 %v1556_v30 }
  0xbc   : > { %1122 = vmatpush3.bf16.msra.mxu1 %v1307_v26 }
  0xbd   : > { %1123 = vmatprep.subr.bf16.mxu1 %v1308_v27 }
  0xbe   : > { %1156 = vmatpush3.bf16.msra.mxu0 %v1313_v50 }
  0xbf   : > { %1157 = vmatprep.subr.bf16.mxu0 %v1556_v30 }
  0xc0   : > { %1124 = vmatpush3.bf16.msra.mxu1 %v1309_v28 }
  0xc1   : > { %1169 = vmatprep.subr.bf16.mxu1 %v1556_v30 }
  0xc2   : > { %1158 = vmatpush3.bf16.msra.mxu0 %v1314_v51 }
  0xc3   : > { %1159 = vmatprep.subr.bf16.mxu0 %v1556_v30 }
  0xc6   : > { %1160 = vmatpush3.bf16.msra.mxu0 %v1315_v52 }
  0xc7   : > { %1161 = vmatprep.subr.bf16.mxu0 %v1556_v30 }
  0xca   : > { %1162 = vmatpush3.bf16.msra.mxu0 %v1316_v53 }
  0xcb   : > { %1163 = vmatprep.subr.bf16.mxu0 %v1556_v30 }
  0xce   : > { %1164 = vmatpush3.bf16.msra.mxu0 %v1317_v54 }
 0x184   : > { %v508_v40 = vpop.f32.mrb[0].mxu0 }
 0x185   : > { %v509_v41 = vadd.f32 %v508_v40, %v421_v38  ;;  %v510_v42 = vpop.f32.mrb[1].mxu0 }
 0x186   : > { %v511_v43 = vadd.f32 %v510_v42, %v425_v39  ;;  %v512_v44 = vpop.f32.mrb[2].mxu0 }
 0x187   : > { %v515_v45 = vmax.f32 %v509_v41, 0.0  ;;  %v513_v46 = vpop.f32.mrb[3].mxu0 }
 0x188   : > { %v516_v47 = vmax.f32 %v511_v43, 0.0 }
 0x189   : > { %v517_v49 = vpack.c.bf16 %v515_v45, %v515_v45 }
 0x18a   : > { %v518_v48 = vpack.c.bf16 %v516_v47, %v516_v47 }
 0x18c   : > { %686 = vmatprep.mubr.bf16.mxu1 %v518_v48 }
 0x18d   : > { %687 = vmatmul.mubr.bf16.vlgmr.msra.gmra.mrb[0].mxu1 %v517_v49 }
 0x18e   : > { %1185 = vmatprep.mubr.msk.bf16.mxu1 %vm1557_vm2, %v1556_v30  ;;  %1170 = vmatpush3.bf16.msra.mxu1 %v1318_v55 }
 0x18f   : > { %1171 = vmatprep.subr.bf16.mxu1 %v1556_v30 }
 0x192   : > { %1172 = vmatpush3.bf16.msra.mxu1 %v1319_v56 }
 0x193   : > { %1173 = vmatprep.subr.bf16.mxu1 %v1556_v30 }
 0x196   : > { %1174 = vmatpush3.bf16.msra.mxu1 %v1320_v57 }
 0x197   : > { %1175 = vmatprep.subr.bf16.mxu1 %v1556_v30 }
 0x19a   : > { %1176 = vmatpush3.bf16.msra.mxu1 %v1321_v58 }
 0x19b   : > { %1177 = vmatprep.subr.bf16.mxu1 %v1556_v30 }
 0x19e   : > { %1178 = vmatpush3.bf16.msra.mxu1 %v1322_v59 }
 0x19f   : > { %1179 = vmatprep.subr.bf16.mxu1 %v1556_v30 }
 0x1a2   : > { %1180 = vmatpush3.bf16.msra.mxu1 %v1323_v60 }
 0x1a3   : > { %1181 = vmatprep.subr.bf16.mxu1 %v1556_v30 }
 0x1a6   : > { %1182 = vmatpush3.bf16.msra.mxu1 %v1324_v6 }
 0x1a7   : > { %1183 = vmatprep.subr.bf16.mxu1 %v1556_v30 }
 0x1aa   : > { %1184 = vmatpush3.bf16.msra.mxu1 %v1325_v7 }
 0x260   : > { %v1125_v61 = vpop.f32.mrb[0].mxu1 }
 0x261   : > { %v1126_v63 = vpop.f32.mrb[1].mxu1 }
 0x262   : > { %v1127_v0 = vadd.f32 %v1126_v63, %v1125_v61  ;;  %v1128_v1 = vpop.f32.mrb[2].mxu1 }
 0x263   : > { %v1129_v2 = vpop.f32.mrb[3].mxu1 }
 0x264   : > { %v689_v3 = vadd.f32 %v1127_v0, %v1070_v62 }
 0x266   : > { %1326 = vtanh.f32 %v689_v3 }
 0x270   : > { %v1327_v4 = vpop.eup %1326 }
 0x271   : > { %v695_v5 = vpack.c.bf16 %v1327_v4, %v1327_v4 }
 0x273   : > { %1166 = vmatmul.mubr.bf16.vlgmr.msra.gmra.mrb[4].mxu0 %v695_v5 }
 0x346   : > { %v801_v9 = vpop.f32.mrb[4].mxu0 }
 0x347   : > { %v802_v10 = vadd.f32 %v1087_v8, %v801_v9  ;;  %v1167_v11 = vpop.f32.mrb[5].mxu0 }
 0x348   : > { %v804_v12 = vpop.f32.mrb[6].mxu0 }
 0x349   : > { %v807_v13 = vmax.f32 %v802_v10, 0.0  ;;  %v1168_v14 = vpop.f32.mrb[7].mxu0 }
 0x34b   : > { %v808_v15 = vpack.c.bf16 %v807_v13, %v807_v13 }
 0x34d   : > { %1186 = vmatmul.mubr.bf16.vlgmr.msra.gmra.mrb[4].mxu1 %v808_v15 }
 0x420   : > { %v914_v17 = vpop.f32.mrb[4].mxu1 }
 0x421   : > { %v915_v18 = vadd.f32 %v1096_v16, %v914_v17  ;;  %v1187_v19 = vpop.f32.mrb[5].mxu1 }
 0x422   : > { %v917_v20 = vpop.f32.mrb[6].mxu1 }
 0x423   : > { %v920_v21 = vpack.c.bf16 %v915_v18, %v915_v18  ;;  %v1188_v22 = vpop.f32.mrb[7].mxu1 }
 0x425   : > { %921 = vst [vmem:[%s405_s14] sm:$0xf] %v920_v21 }
 0x426   : > { %1483 = shalt.err (!%p1480_p12)
}
 0x427   : > { %s1484_s1 = scalar_lea.hbm %s1884_s19, 64  ;;  %s1488_s13 = scalar_lea.hbm %s1959_s18, 128 }
 0x428   : > { %p1485_p13 = scmp.ne.s32.totalorder %s1884_s19, %s1484_s1  ;;  %p1489_p9 = scmp.lt.u32.totalorder %s1884_s19, %s1959_s18 }
 0x429   : > { %p1490_p4 = scmp.lt.u32.totalorder %s1488_s13, %s1484_s1  ;;  %p1492_p6 = scmp.lt.u32.totalorder %s1484_s1, %s1884_s19 }
 0x42a   : > { %p1486_p3 = pnand %p1485_p13, %p1960_p0 }
 0x42b   : > { %p1491_p8 = por %p1490_p4, %p1489_p9 }
 0x42c   : > { %p1487_p7 = pneg %p1486_p3 }
 0x42d   : > { %p1493_p2 = por %p1492_p6, %p1491_p8 }
 0x42f   : > { %p1494_p5 = pnand %p1493_p2, %p1487_p7 }
 0x431   : > { %1497 = shalt.err (!%p1494_p5)
}
 0x432   : > { %1207 = dma.vmem_to_hbm [thread:$0]  (%p1960_p0), %s1886_s26, 64, %s1884_s19, %s923_s17  }
 0x433 PF: > { %s948_s16 = sand.u32 1, %s1532_s30   ;;  %p1961_p10 = scmp.ne.s32.totalorder %s1952_s28, 0 }
 0x434   : > { %p1962_p1 = scmp.ge.s32.totalorder %s1544_s12, 2  ;;  %s949_s15 = scalar_lea.sflag [#allocation4], %s948_s16 }
 0x436   : > { %p1227_p11 = pnand %p1962_p1, %p1961_p10 }
 0x438   : > { %1527 = dma.done.wait (!%p1227_p11), %s949_s15, 64  }
 0x439   : > { %1529 = vsyncadd (!%p1227_p11), %s949_s15, 4294967232  ;;  %p24_p12 = scmp.ge.s32.totalorder %s1754_s27, 4   ;;  %s1963_s30 = smov %s1536_s10 }
 0x43a   : > { %s1964_s10 = smov %s1540_s11  ;;  %s1965_s11 = smov %s1765_s25 }
 0x43b   : > { %s1966_s12 = smov %s1754_s27  ;;  %26 = sbr.rel (!%p24_p12) target bundleno = 10 (0xa), region = 117 }
 0x442   :  { %954 = vsyncpa [#allocation3], 1 }
 0x443   :  { %956 = vsyncpa [#allocation3 + $0x1], 1 }
 0x444   :  { %957 = vsyncpa [#allocation6], 1 }
 0x445   :  { %958 = vsyncpa [#allocation9], 1 }
 0x446   :  { %959 = vsyncpa [#allocation4], 1 }
 0x447   :  { %961 = vsyncpa [#allocation4 + $0x1], 1 }

</bundles_post_ra>
